<compile_context>
chip_gen: v5e
topology: v5e:2x2
jax: 0.10.0
libtpu: 0.0.40
codegen_flags: <defaults>
</compile_context>

<pallas_src>
import functools

import jax
import jax.numpy as jnp
from jax import lax
from jax.experimental import pallas as pl
from jax.experimental.pallas import tpu as pltpu


_VMEM_LIMIT_BYTES = 32 * 1024 * 1024   # safe on v5e/v6e/v7x; demo shapes are far below


def _pad_fc_weight(w_fc, n_total):
    """Zero-pad fc rows from hidden_dim to N so fc(relu(h)[:, :hidden_dim]) == relu(h) @ W_pad."""
    hidden_dim = w_fc.shape[0]
    assert hidden_dim <= n_total
    # TODO(synk): assumes 'alm_exc' is the leading contiguous hidden_dim slice of h.
    return jnp.pad(w_fc, ((0, n_total - hidden_dim), (0, 0)))


# ---------------------------------------------------------------------------
# Single-step kernel (Policy.forward): grid-less, whole operands VMEM resident
# ---------------------------------------------------------------------------
def _policy_step_kernel(h_ref, obs_ref, *refs, alpha, sigma_rec, sigma_inp, add_noise):
    if add_noise:
        (eps_i_ref, eps_r_ref, wrec_ref, winp_ref, brec_ref,
         wfc_ref, bfc_ref, u_ref, hnew_ref) = refs
    else:
        (wrec_ref, winp_ref, brec_ref, wfc_ref, bfc_ref, u_ref, hnew_ref) = refs

    h = h_ref[...]
    obs = obs_ref[...]
    if add_noise:
        obs = obs + sigma_inp * eps_i_ref[...]

    r = jnp.maximum(h, 0.0)
    pre = (jnp.dot(r, wrec_ref[...], preferred_element_type=jnp.float32)
           + jnp.dot(obs, winp_ref[...], preferred_element_type=jnp.float32)
           + brec_ref[...])
    if add_noise:
        pre = pre + sigma_rec * eps_r_ref[...]

    h_new = h + alpha * (pre - h)
    # 'alm_exc' readout: rows of wfc beyond hidden_dim are zero => equals
    # fc(relu(h_new)[:, :hidden_dim]) without a narrow (<128 lane) slice.
    logits = jnp.dot(jnp.maximum(h_new, 0.0), wfc_ref[...],
                     preferred_element_type=jnp.float32) + bfc_ref[...]
    u_ref[...] = jax.nn.sigmoid(logits)
    hnew_ref[...] = h_new


def policy_forward(h, obs, params, *, dt=10.0, t_const=100.0,
                   sigma_rec=0.01, sigma_inp=0.01, noise=True, key=None):
    """Single mRNN step + 'alm_exc' sigmoid readout. Returns (u, h_new)."""
    B, N = h.shape
    I = obs.shape[1]
    O = params["w_fc"].shape[1]
    w_fc_pad = _pad_fc_weight(params["w_fc"], N)

    kernel = functools.partial(
        _policy_step_kernel,
        alpha=float(dt) / float(t_const),
        sigma_rec=float(sigma_rec),
        sigma_inp=float(sigma_inp),
        add_noise=bool(noise),
    )

    vmem = pl.BlockSpec(memory_space=pltpu.MemorySpace.VMEM)

    inputs = [h, obs]
    if noise:
        if key is None:
            key = jax.random.PRNGKey(0)
        ki, kr = jax.random.split(key)
        # Host-side Gaussian noise (on-chip PRNG primitives have no CPU/interpret lowering).
        inputs += [jax.random.normal(ki, (B, I), jnp.float32),
                   jax.random.normal(kr, (B, N), jnp.float32)]
    inputs += [params["w_rec"], params["w_inp"], params["b_rec"], w_fc_pad, params["b_fc"]]

    u, h_new = pl.pallas_call(
        kernel,
        # no grid: single invocation, whole operands resident in VMEM, no double-buffering
        in_specs=[vmem] * len(inputs),
        out_specs=(vmem, vmem),
        out_shape=(jax.ShapeDtypeStruct((B, O), jnp.float32),
                   jax.ShapeDtypeStruct((B, N), jnp.float32)),
        compiler_params=pltpu.CompilerParams(vmem_limit_bytes=_VMEM_LIMIT_BYTES),
    )(*inputs)

    if O == 1:                      # torch: u.squeeze(dim=1)
        u = jnp.squeeze(u, axis=1)
    return u, h_new


# ---------------------------------------------------------------------------
# Fused rollout kernel: T steps in ONE grid step (weights + obs drive resident)
# ---------------------------------------------------------------------------
def _policy_rollout_kernel(h0_ref, drive_ref, wrec_ref, wfc_ref, bfc_ref,
                           u_ref, hlast_ref, *, alpha, n_steps):
    w_rec = wrec_ref[...]
    w_fc = wfc_ref[...]
    # hoist the (1,O)->(tb,O) broadcast out of the time loop (JAX does not CSE it)
    b_fc = jnp.broadcast_to(bfc_ref[...], (h0_ref.shape[0], bfc_ref.shape[1]))

    def step(t, h):
        r = jnp.maximum(h, 0.0)
        pre = jnp.dot(r, w_rec, preferred_element_type=jnp.float32) + drive_ref[t]
        h_new = h + alpha * (pre - h)
        logits = jnp.dot(jnp.maximum(h_new, 0.0), w_fc,
                         preferred_element_type=jnp.float32) + b_fc
        u_ref[t] = jax.nn.sigmoid(logits)      # resident (T, tb, O) block
        return h_new

    # h is the fori_loop carry (stays in vregs/VMEM); h_last written once.
    hlast_ref[...] = lax.fori_loop(0, n_steps, step, h0_ref[...])


def policy_rollout(h0, obs_seq, params, *, dt=10.0, t_const=100.0,
                   sigma_rec=0.01, sigma_inp=0.01, noise=True, key=None,
                   block_b=None):
    """T fused mRNN steps in ONE pallas_call. Semantically equivalent to applying
    Policy.forward once per obs_seq[t]. Returns (u_seq: (T,B,O), h_last: (B,N))."""
    T, B, I = obs_seq.shape
    N = h0.shape[1]
    O = params["w_fc"].shape[1]
    tb = B if block_b is None else int(block_b)
    assert B % tb == 0, "batch must be divisible by block_b"
    assert tb == B or tb % 8 == 0, "block_b must be a multiple of 8 (sublane constraint)"
    nb = B // tb

    w_fc_pad = _pad_fc_weight(params["w_fc"], N)

    # Hoist the input projection out of the recurrent loop:
    #   drive[t] = (obs[t] + sigma_inp*eps_i[t]) @ W_inp + b_rec + sigma_rec*eps_r[t]
    # One big, well-utilized matmul outside the kernel instead of a K=I matmul per step.
    obs_eff = obs_seq
    if noise:
        if key is None:
            key = jax.random.PRNGKey(0)
        ki, kr = jax.random.split(key)
        obs_eff = obs_eff + sigma_inp * jax.random.normal(ki, obs_seq.shape, jnp.float32)
    drive = jnp.einsum("tbi,in->tbn", obs_eff, params["w_inp"]) + params["b_rec"]
    if noise:
        drive = drive + sigma_rec * jax.random.normal(kr, (T, B, N), jnp.float32)
    drive = drive.astype(jnp.float32)

    kernel = functools.partial(
        _policy_rollout_kernel,
        alpha=float(dt) / float(t_const),
        n_steps=T,
    )

    u_seq, h_last = pl.pallas_call(
        kernel,
        grid=(nb,),
        in_specs=[
            pl.BlockSpec((tb, N), lambda b: (b, 0)),        # h0
            pl.BlockSpec((T, tb, N), lambda b: (0, b, 0)),  # drive (resident over T)
            pl.BlockSpec((N, N), lambda b: (0, 0)),         # W_rec (resident)
            pl.BlockSpec((N, O), lambda b: (0, 0)),         # W_fc (zero-padded rows)
            pl.BlockSpec((1, O), lambda b: (0, 0)),         # b_fc
        ],
        out_specs=(
            pl.BlockSpec((T, tb, O), lambda b: (0, b, 0)),  # u_seq (resident, 1 writeback)
            pl.BlockSpec((tb, N), lambda b: (b, 0)),        # h_last (written once)
        ),
        out_shape=(jax.ShapeDtypeStruct((T, B, O), jnp.float32),
                   jax.ShapeDtypeStruct((B, N), jnp.float32)),
        compiler_params=pltpu.CompilerParams(
            dimension_semantics=("parallel",),              # batch tiles across TCs (v7x)
            vmem_limit_bytes=_VMEM_LIMIT_BYTES),
    )(h0, drive, params["w_rec"], w_fc_pad, params["b_fc"])

    if O == 1:
        u_seq = jnp.squeeze(u_seq, axis=2)
    return u_seq, h_last


# ---------------------------------------------------------------------------
# Deterministic parameter construction (synthetic, no checkpoint)
# ---------------------------------------------------------------------------
def make_params(key, n_total, input_dim, hidden_dim, output_dim,
                constrained=True, lb_rec=0.0, ub_rec=10.0,
                lb_inp=0.0, ub_inp=10.0):
    k = jax.random.split(key, 4)
    w_rec = jax.random.normal(k[0], (n_total, n_total), jnp.float32) / float(n_total)
    w_inp = jax.random.normal(k[1], (input_dim, n_total), jnp.float32) / jnp.sqrt(input_dim)
    b_rec = jnp.zeros((1, n_total), jnp.float32)
    bound = 1.0 / jnp.sqrt(hidden_dim)      # torch.nn.Linear default init
    w_fc = jax.random.uniform(k[2], (hidden_dim, output_dim), jnp.float32, -bound, bound)
    b_fc = jax.random.uniform(k[3], (1, output_dim), jnp.float32, -bound, bound)

    if constrained:
        # constrained mRNN: non-negative magnitudes clipped to [lower, upper] bounds
        # TODO(synk): exact Dale's-law sign masking lives in the (unprovided) mRNN class.
        w_rec = jnp.clip(jnp.abs(w_rec), lb_rec, ub_rec)
        w_inp = jnp.clip(jnp.abs(w_inp), lb_inp, ub_inp)

    return dict(w_rec=w_rec, w_inp=w_inp, b_rec=b_rec, w_fc=w_fc, b_fc=b_fc)


if __name__ == "__main__":
    # (8,128)-aligned shapes: B multiple of 8 sublanes, N a full 128-lane tile.
    B = 8
    N_TOTAL = 128      # total mRNN hidden units (all regions)
    INPUT_DIM = 16     # observation dim
    HIDDEN_DIM = 32    # size of 'alm_exc' region == fc input dim
    OUTPUT_DIM = 8     # fc output dim
    T = 16             # rollout length for the fused kernel

    root = jax.random.PRNGKey(0)
    kp, kh, ko, kn1, kn2 = jax.random.split(root, 5)

    params = make_params(kp, N_TOTAL, INPUT_DIM, HIDDEN_DIM, OUTPUT_DIM)
    h0 = jax.random.normal(kh, (B, N_TOTAL), jnp.float32) * 0.1
    obs_seq = jax.random.normal(ko, (T, B, INPUT_DIM), jnp.float32)
    obs0 = obs_seq[0]

    # --- single step (Policy.forward), noisy and deterministic paths ----------
    u_nz, h_nz = policy_forward(h0, obs0, params, noise=True, key=kn1)
    u_dt, h_dt = policy_forward(h0, obs0, params, noise=False)

    # --- fused rollout (noisy path) --------------------------------------------
    u_seq_nz, h_last_nz = policy_rollout(h0, obs_seq, params, noise=True, key=kn2)

    # --- fused rollout vs T sequential single-step calls (deterministic) ------
    u_seq, h_last = policy_rollout(h0, obs_seq, params, noise=False)
    h_ref = h0
    u_ref_steps = []
    for t in range(T):
        u_t, h_ref = policy_forward(h_ref, obs_seq[t], params, noise=False)
        u_ref_steps.append(u_t)
    u_ref_seq = jnp.stack(u_ref_steps, axis=0)

    jax.block_until_ready((u_nz, h_nz, u_dt, h_dt, u_seq_nz, h_last_nz,
                           u_seq, h_last, u_ref_seq, h_ref))

    # shape / sanity checks
    assert u_nz.shape == (B, OUTPUT_DIM) and h_nz.shape == (B, N_TOTAL)
    assert u_seq.shape == (T, B, OUTPUT_DIM) and h_last.shape == (B, N_TOTAL)
    for arr in (u_nz, h_nz, u_dt, h_dt, u_seq_nz, h_last_nz, u_seq, h_last):
        assert bool(jnp.all(jnp.isfinite(arr)))
    assert bool(jnp.all((u_nz >= 0.0) & (u_nz <= 1.0)))          # sigmoid range
    assert bool(jnp.all((u_seq >= 0.0) & (u_seq <= 1.0)))
    # fused rollout must match T sequential forward() calls on the deterministic path
    assert float(jnp.max(jnp.abs(u_seq - u_ref_seq))) < 1e-4
    assert float(jnp.max(jnp.abs(h_last - h_ref))) < 1e-4

    print("KERNEL_OK")
</pallas_src>

<mosaic_0001>
module attributes {stable_mosaic.version = 11 : i64} {
  func.func @_policy_step_kernel(%arg0: memref<8x128xf32, #tpu.memory_space<vmem>>, %arg1: memref<8x16xf32, #tpu.memory_space<vmem>>, %arg2: memref<8x16xf32, #tpu.memory_space<vmem>>, %arg3: memref<8x128xf32, #tpu.memory_space<vmem>>, %arg4: memref<128x128xf32, #tpu.memory_space<vmem>>, %arg5: memref<16x128xf32, #tpu.memory_space<vmem>>, %arg6: memref<1x128xf32, #tpu.memory_space<vmem>>, %arg7: memref<128x8xf32, #tpu.memory_space<vmem>>, %arg8: memref<1x8xf32, #tpu.memory_space<vmem>>, %arg9: memref<8x8xf32, #tpu.memory_space<vmem>>, %arg10: memref<8x128xf32, #tpu.memory_space<vmem>>) attributes {dimension_semantics = [], scalar_prefetch = 0 : i64, scratch_operands = 0 : i64, tpu.core_type = #tpu.core_type<tc>} {
    %c0 = arith.constant 0 : index
    %c0_0 = arith.constant 0 : index
    %0 = vector.load %arg0[%c0, %c0_0] : memref<8x128xf32, #tpu.memory_space<vmem>>, vector<8x128xf32>
    %c0_1 = arith.constant 0 : index
    %c0_2 = arith.constant 0 : index
    %1 = vector.load %arg1[%c0_1, %c0_2] : memref<8x16xf32, #tpu.memory_space<vmem>>, vector<8x16xf32>
    %c0_3 = arith.constant 0 : index
    %c0_4 = arith.constant 0 : index
    %2 = vector.load %arg2[%c0_3, %c0_4] : memref<8x16xf32, #tpu.memory_space<vmem>>, vector<8x16xf32>
    %cst = arith.constant 0.00999999977 : f32
    %3 = vector.broadcast %cst : f32 to vector<8x16xf32>
    %4 = arith.mulf %3, %2 : vector<8x16xf32>
    %5 = arith.addf %1, %4 : vector<8x16xf32>
    %cst_5 = arith.constant 0.000000e+00 : f32
    %6 = vector.broadcast %cst_5 : f32 to vector<8x128xf32>
    %7 = arith.maximumf %0, %6 : vector<8x128xf32>
    %c0_6 = arith.constant 0 : index
    %c0_7 = arith.constant 0 : index
    %8 = vector.load %arg4[%c0_6, %c0_7] : memref<128x128xf32, #tpu.memory_space<vmem>>, vector<128x128xf32>
    %cst_8 = arith.constant dense<0.000000e+00> : vector<8x128xf32>
    %9 = tpu.matmul %7, %8, %cst_8 {dimension_numbers = #tpu.dot_dimension_numbers<[1], [0], [0], [1], [0, 0, 1, 1], [], []>} : vector<8x128xf32>, vector<128x128xf32>, vector<8x128xf32> -> vector<8x128xf32>
    %c0_9 = arith.constant 0 : index
    %c0_10 = arith.constant 0 : index
    %10 = vector.load %arg5[%c0_9, %c0_10] : memref<16x128xf32, #tpu.memory_space<vmem>>, vector<16x128xf32>
    %cst_11 = arith.constant dense<0.000000e+00> : vector<8x128xf32>
    %11 = tpu.matmul %5, %10, %cst_11 {dimension_numbers = #tpu.dot_dimension_numbers<[1], [0], [0], [1], [0, 0, 1, 1], [], []>} : vector<8x16xf32>, vector<16x128xf32>, vector<8x128xf32> -> vector<8x128xf32>
    %12 = arith.addf %9, %11 : vector<8x128xf32>
    %c0_12 = arith.constant 0 : index
    %c0_13 = arith.constant 0 : index
    %13 = vector.load %arg6[%c0_12, %c0_13] : memref<1x128xf32, #tpu.memory_space<vmem>>, vector<1x128xf32>
    %14 = vector.broadcast %13 : vector<1x128xf32> to vector<8x128xf32>
    %15 = arith.addf %12, %14 : vector<8x128xf32>
    %c0_14 = arith.constant 0 : index
    %c0_15 = arith.constant 0 : index
    %16 = vector.load %arg3[%c0_14, %c0_15] : memref<8x128xf32, #tpu.memory_space<vmem>>, vector<8x128xf32>
    %cst_16 = arith.constant 0.00999999977 : f32
    %17 = vector.broadcast %cst_16 : f32 to vector<8x128xf32>
    %18 = arith.mulf %17, %16 : vector<8x128xf32>
    %19 = arith.addf %15, %18 : vector<8x128xf32>
    %20 = arith.subf %19, %0 : vector<8x128xf32>
    %cst_17 = arith.constant 1.000000e-01 : f32
    %21 = vector.broadcast %cst_17 : f32 to vector<8x128xf32>
    %22 = arith.mulf %21, %20 : vector<8x128xf32>
    %23 = arith.addf %0, %22 : vector<8x128xf32>
    %cst_18 = arith.constant 0.000000e+00 : f32
    %24 = vector.broadcast %cst_18 : f32 to vector<8x128xf32>
    %25 = arith.maximumf %23, %24 : vector<8x128xf32>
    %c0_19 = arith.constant 0 : index
    %c0_20 = arith.constant 0 : index
    %26 = vector.load %arg7[%c0_19, %c0_20] : memref<128x8xf32, #tpu.memory_space<vmem>>, vector<128x8xf32>
    %cst_21 = arith.constant dense<0.000000e+00> : vector<8x8xf32>
    %27 = tpu.matmul %25, %26, %cst_21 {dimension_numbers = #tpu.dot_dimension_numbers<[1], [0], [0], [1], [0, 0, 1, 1], [], []>} : vector<8x128xf32>, vector<128x8xf32>, vector<8x8xf32> -> vector<8x8xf32>
    %c0_22 = arith.constant 0 : index
    %c0_23 = arith.constant 0 : index
    %28 = vector.load %arg8[%c0_22, %c0_23] : memref<1x8xf32, #tpu.memory_space<vmem>>, vector<1x8xf32>
    %29 = vector.broadcast %28 : vector<1x8xf32> to vector<8x8xf32>
    %30 = arith.addf %27, %29 : vector<8x8xf32>
    %31 = arith.negf %30 : vector<8x8xf32>
    %32 = math.exp %31 : vector<8x8xf32>
    %cst_24 = arith.constant 1.000000e+00 : f32
    %33 = vector.broadcast %cst_24 : f32 to vector<8x8xf32>
    %34 = arith.addf %33, %32 : vector<8x8xf32>
    %35 = arith.divf %33, %34 : vector<8x8xf32>
    %c0_25 = arith.constant 0 : index
    %c0_26 = arith.constant 0 : index
    %36 = vector.load %arg9[%c0_25, %c0_26] : memref<8x8xf32, #tpu.memory_space<vmem>>, vector<8x8xf32>
    tpu.vector_store %arg9[%c0_25, %c0_26], %35 {strides = array<i32>} : memref<8x8xf32, #tpu.memory_space<vmem>>, vector<8x8xf32>,
    %c0_27 = arith.constant 0 : index
    %c0_28 = arith.constant 0 : index
    %37 = vector.load %arg10[%c0_27, %c0_28] : memref<8x128xf32, #tpu.memory_space<vmem>>, vector<8x128xf32>
    tpu.vector_store %arg10[%c0_27, %c0_28], %23 {strides = array<i32>} : memref<8x128xf32, #tpu.memory_space<vmem>>, vector<8x128xf32>,
    return
  }
}

</mosaic_0001>

<bundles_post_ra>
// kernel: tpu_custom_call.1
= control target key start
LH: loop header
LB: loop body
LE: loop exit
PB: predicated region body
PF: predicated region fallthrough
CT: control target
= control target key end

     0   :  { %16 = vsyncpa [#allocation3], 0  ;;  %s626_s0 = inlined_call_operand.vmem [shape: f32[8,128], index: 0, kind: input, shape index: {}]   ;;  %s627_s1 = inlined_call_operand.hbm [shape: f32[8,16], index: 1, kind: input, shape index: {}]   ;;  %s628_s2 = inlined_call_operand.hbm [shape: f32[8,16], index: 2, kind: input, shape index: {}]   ;;  %s629_s3 = inlined_call_operand.hbm [shape: f32[8,128], index: 3, kind: input, shape index: {}]   ;;  %s630_s4 = inlined_call_operand.vmem [shape: f32[128,128], index: 4, kind: input, shape index: {}]   ;;  %s631_s5 = inlined_call_operand.hbm [shape: f32[16,128], index: 5, kind: input, shape index: {}]   ;;  %s632_s6 = inlined_call_operand.vmem [shape: f32[1,128], index: 6, kind: input, shape index: {}]   ;;  %s633_s7 = inlined_call_operand.vmem [shape: f32[128,8], index: 7, kind: input, shape index: {}]   ;;  %s634_s8 = inlined_call_operand.vmem [shape: f32[1,8], index: 8, kind: input, shape index: {}]   ;;  %s635_s9 = inlined_call_operand.hbm [shape: f32[8,8], index: 9, kind: output, shape index: {0}]   ;;  %s636_s10 = inlined_call_operand.hbm [shape: f32[8,128], index: 10, kind: output, shape index: {1}]  }
   0x1   :  { %17 = vsyncpa [#allocation6], 0 }
   0x2   :  { %18 = vsyncpa [#allocation9], 0 }
   0x3   :  { %19 = vsyncpa [#allocation4], 0  ;;  %s39_s15 = sshll.u32 %s628_s2, 4  ;;  %s40_s15 = int_to_ptr.hbm [resolvable:$true] %s39_s15 }
   0x4   :  { %20 = vsyncpa [#allocation12], 0  ;;  %s440_s16 = smov [#allocation5]   ;;  %s28_s20 = sshll.u32 %s627_s1, 4  ;;  %s29_s20 = int_to_ptr.hbm [resolvable:$true] %s28_s20 }
   0x5   :  { %s41_s17 = sshll.u32 %s440_s16, 4  ;;  %s441_s21 = smov [#allocation2]   ;;  %s42_s17 = int_to_ptr.vmem [resolvable:$true] %s41_s17 }
   0x6   :  { %44 = dma.hbm_to_vmem [thread:$0]  %s40_s15, 128, %s42_s17, [#allocation6]  }
   0x7   :  { %s30_s22 = sshll.u32 %s441_s21, 4  ;;  %s50_s25 = sshll.u32 %s629_s3, 4  ;;  %s31_s22 = int_to_ptr.vmem [resolvable:$true] %s30_s22  ;;  %s51_s25 = int_to_ptr.hbm [resolvable:$true] %s50_s25 }
   0x8   :  { %33 = dma.hbm_to_vmem [thread:$0]  %s29_s20, 128, %s31_s22, [#allocation3]  }
   0x9   :  { %s62_s27 = sshll.u32 %s631_s5, 4  ;;  %s442_s28 = smov [#allocation7]   ;;  %s63_s27 = int_to_ptr.hbm [resolvable:$true] %s62_s27 }
   0xa   :  { %s52_s29 = sshll.u32 %s442_s28, 4  ;;  %s443_s1 = smov [#allocation8]   ;;  %s53_s29 = int_to_ptr.vmem [resolvable:$true] %s52_s29 }
   0xb   :  { %55 = dma.hbm_to_vmem [thread:$0]  %s51_s25, 128, %s53_s29, [#allocation6]  }
   0xc   :  { %s64_s30 = sshll.u32 %s443_s1, 4  ;;  %s444_s11 = smov 128   ;;  %s65_s30 = int_to_ptr.vmem [resolvable:$true] %s64_s30 }
   0xd   :  { %s445_s12 = smov 8  }
   0xe   :  { %70 = dma.hbm_to_vmem [thread:$0]  %s63_s27, 256, %s65_s30, [#allocation9], %s444_s11, %s444_s11, %s445_s12  }
   0xf   :  { %430 = dma.done.wait [#allocation3], 128  }
  0x10   :  { %431 = vsyncadd [#allocation3], 4294967168 }
  0x11   :  { %432 = dma.done.wait [#allocation6], 256  }
  0x12   :  { %433 = vsyncadd [#allocation6], 4294967040 }
  0x13   :  { %434 = dma.done.wait [#allocation9], 256  }
  0x14   :  { %435 = vsyncadd [#allocation9], 4294967040  ;;  %v114_v0 = vld [vmem:[%s630_s4 + $0x78] sm:$0xff]  ;;  %v113_v1 = vld [vmem:[%s630_s4 + $0x70] sm:$0xff]  ;;  %vm117_vm0 = vcmask 130048   ;;  %s253_s30 = sshll.u32 %s636_s10, 4  ;;  %s254_s30 = int_to_ptr.hbm [resolvable:$true] %s253_s30 }
  0x15   :  { %141 = vmatpush.msra.mxu1 %v114_v0  ;;  %v112_v2 = vld [vmem:[%s630_s4 + $0x68] sm:$0xff]  ;;  %v111_v3 = vld [vmem:[%s630_s4 + $0x60] sm:$0xff]  ;;  %v115_v5 = vld [vmem:[#allocation8] sm:$0xff]  ;;  %s447_s10 = smov [#allocation10]   ;;  %vm232_vm4 = vcmask 64512  }
  0x16   :  { %v116_v4 = vld [vmem:[#allocation8 + $0x8] sm:$0xff]  ;;  %v110_v6 = vld [vmem:[%s630_s4 + $0x58] sm:$0xff]  ;;  %v95_v8 = vld [vmem:[#allocation5] sm:$0xff]  ;;  %s240_s12 = sshll.u32 %s447_s10, 4  ;;  %s241_s12 = int_to_ptr.vmem [resolvable:$true] %s240_s12 }
  0x17   :  { %142 = vmatpush.msra.mxu1 %v113_v1  ;;  %135 = vmatpush.msra.mxu0 %v116_v4  ;;  %v94_v7 = vld [vmem:[#allocation2] sm:$0xff]  ;;  %v96_v9 = vmul.f32 0.01, %v95_v8  ;;  %v188_v10 = vld [vmem:[%s633_s7 + $0x78] sm:$0xff]  ;;  %v187_v11 = vld [vmem:[%s633_s7 + $0x70] sm:$0xff] }
  0x18   :  { %v109_v12 = vld [vmem:[%s630_s4 + $0x50] sm:$0xff]  ;;  %193 = vmatpush.msra.mxu2 %v188_v10  ;;  %v186_v14 = vld [vmem:[%s633_s7 + $0x68] sm:$0xff]  ;;  %v185_v16 = vld [vmem:[%s633_s7 + $0x60] sm:$0xff] }
  0x19   :  { %143 = vmatpush.msra.mxu1 %v112_v2  ;;  %136 = vmatpush.msra.mxu0 %v115_v5  ;;  %v97_v13 = vadd.f32 %v96_v9, %v94_v7  ;;  %v108_v15 = vld [vmem:[%s630_s4 + $0x48] sm:$0xff]  ;;  %v107_v17 = vld [vmem:[%s630_s4 + $0x40] sm:$0xff]  ;;  %v184_v18 = vld [vmem:[%s633_s7 + $0x58] sm:$0xff] }
  0x1a   :  { %194 = vmatpush.msra.mxu2 %v187_v11  ;;  %v106_v19 = vld [vmem:[%s630_s4 + $0x38] sm:$0xff]  ;;  %v183_v20 = vld [vmem:[%s633_s7 + $0x50] sm:$0xff]  ;;  %v182_v22 = vld [vmem:[%s633_s7 + $0x48] sm:$0xff] }
  0x1b   :  { %144 = vmatpush.msra.mxu1 %v111_v3  ;;  %270 = vmatmul.msk.f32.vlgmr.msra.gmra.mxu0 %vm117_vm0, %v97_v13  ;;  %v105_v21 = vld [vmem:[%s630_s4 + $0x30] sm:$0xff]  ;;  %v104_v23 = vld [vmem:[%s630_s4 + $0x28] sm:$0xff]  ;;  %v181_v24 = vld [vmem:[%s633_s7 + $0x40] sm:$0xff] }
  0x1c   :  { %195 = vmatpush.msra.mxu2 %v186_v14  ;;  %v103_v25 = vld [vmem:[%s630_s4 + $0x20] sm:$0xff]  ;;  %v102_v26 = vld [vmem:[%s630_s4 + $0x18] sm:$0xff]  ;;  %v101_v27 = vld [vmem:[%s630_s4 + $0x10] sm:$0xff] }
  0x1d   :  { %145 = vmatpush.msra.mxu1 %v110_v6  ;;  %v93_v28 = vld [vmem:[%s626_s0] sm:$0xff]  ;;  %v100_v29 = vld [vmem:[%s630_s4 + $0x8] sm:$0xff]  ;;  %v180_v32 = vld [vmem:[%s633_s7 + $0x38] sm:$0xff] }
  0x1e   :  { %196 = vmatpush.msra.mxu2 %v185_v16  ;;  %v99_v30 = vld [vmem:[%s630_s4] sm:$0xff]  ;;  %v98_v31 = vmax.f32 %v93_v28, 0.0  ;;  %v179_v33 = vld [vmem:[%s633_s7 + $0x30] sm:$0xff]  ;;  %v178_v34 = vld [vmem:[%s633_s7 + $0x28] sm:$0xff] }
  0x1f   :  { %146 = vmatpush.msra.mxu1 %v109_v12  ;;  %v177_v35 = vld [vmem:[%s633_s7 + $0x20] sm:$0xff]  ;;  %v176_v36 = vld [vmem:[%s633_s7 + $0x18] sm:$0xff]  ;;  %v175_v37 = vld [vmem:[%s633_s7 + $0x10] sm:$0xff] }
  0x20   :  { %197 = vmatpush.msra.mxu2 %v184_v18  ;;  %v174_v38 = vld [vmem:[%s633_s7 + $0x8] sm:$0xff]  ;;  %v173_v39 = vld [vmem:[%s633_s7] sm:$0xff]  ;;  %v166_v41 = vld [vmem:[#allocation7] sm:$0xff]  ;;  %s446_s7 = smov [#allocation11]  }
  0x21   :  { %147 = vmatpush.msra.mxu1 %v108_v15  ;;  %v280_v42 = vld [vmem:[%s632_s6] ss:$0 sm:$0xff]  ;;  %v167_v45 = vmul.f32 0.01, %v166_v41  ;;  %s251_s28 = sshll.u32 %s446_s7, 4  ;;  %s252_s28 = int_to_ptr.vmem [resolvable:$true] %s251_s28 }
  0x22   :  { %198 = vmatpush.msra.mxu2 %v183_v20  ;;  %v281_v52 = vld [vmem:[%s634_s8] ss:$0 sm:$0xff]  ;;  %s242_s8 = sshll.u32 %s635_s9, 4  ;;  %s243_s8 = int_to_ptr.hbm [resolvable:$true] %s242_s8 }
  0x23   :  { %148 = vmatpush.msra.mxu1 %v107_v17 }
  0x24   :  { %199 = vmatpush.msra.mxu2 %v182_v22 }
  0x25   :  { %149 = vmatpush.msra.mxu1 %v106_v19 }
  0x26   :  { %200 = vmatpush.msra.mxu2 %v181_v24 }
  0x27   :  { %150 = vmatpush.msra.mxu1 %v105_v21 }
  0x28   :  { %201 = vmatpush.msra.mxu2 %v180_v32 }
  0x29   :  { %151 = vmatpush.msra.mxu1 %v104_v23 }
  0x2a   :  { %202 = vmatpush.msra.mxu2 %v179_v33 }
  0x2b   :  { %152 = vmatpush.msra.mxu1 %v103_v25 }
  0x2c   :  { %203 = vmatpush.msra.mxu2 %v178_v34 }
  0x2d   :  { %153 = vmatpush.msra.mxu1 %v102_v26 }
  0x2e   :  { %204 = vmatpush.msra.mxu2 %v177_v35 }
  0x2f   :  { %154 = vmatpush.msra.mxu1 %v101_v27 }
  0x30   :  { %205 = vmatpush.msra.mxu2 %v176_v36 }
  0x31   :  { %155 = vmatpush.msra.mxu1 %v100_v29 }
  0x32   :  { %206 = vmatpush.msra.mxu2 %v175_v37 }
  0x33   :  { %156 = vmatpush.msra.mxu1 %v99_v30 }
  0x34   :  { %157 = vmatmul.f32.vlgmr.msra.gmra.mxu1 %v98_v31  ;;  %207 = vmatpush.msra.mxu2 %v174_v38 }
  0x36   :  { %208 = vmatpush.msra.mxu2 %v173_v39 }
  0x98   :  { %v138_v40 = vpop.f32.mrf.mxu0 }
  0xb1   :  { %v158_v43 = vpop.f32.mrf.mxu1 }
  0xb2   :  { %v159_v44 = vadd.f32 %v158_v43, %v138_v40 }
  0xb4   :  { %v165_v46 = vadd.f32 %v280_v42, %v159_v44 }
  0xb6   :  { %v168_v47 = vadd.f32 %v167_v45, %v165_v46 }
  0xb8   :  { %v169_v48 = vsub.f32 %v168_v47, %v93_v28 }
  0xba   :  { %v170_v49 = vmul.f32 0.1, %v169_v48 }
  0xbc   :  { %v171_v50 = vadd.f32 %v170_v49, %v93_v28 }
  0xbe   :  { %v172_v51 = vmax.f32 %v171_v50, 0.0  ;;  %234 = vst [vmem:[#allocation11] sm:$0xff] %v171_v50 }
  0xbf   :  { %256 = dma.vmem_to_hbm [thread:$0]  %s252_s28, 128, %s254_s30, [#allocation12]  }
  0xc0   :  { %209 = vmatmul.f32.vlgmr.msra.gmra.mxu2 %v172_v51 }
 0x143   :  { %v210_v53 = vpop.f32.mrf.mxu2 }
 0x144   :  { %v211_v54 = vadd.f32 %v281_v52, %v210_v53 }
 0x146   :  { %v271_v55 = vmul.f32 -1.442695, %v211_v54 }
 0x148   :  { %282 = vpow2.f32 %v271_v55 }
 0x14e   :  { %v283_v56 = vpop.eup %282 }
 0x14f   :  { %v216_v57 = vadd.f32 1.0, %v283_v56 }
 0x151   :  { %284 = vrcp.f32 %v216_v57  ;;  %v228_v61 = vand.u32 2147483648, %v216_v57  ;;  %v226_v63 = vand.u32 2147483647, %v216_v57  ;;  %vm222_vm2 = vweird.f32 %v216_v57 }
 0x153   :  { %v229_v1 = vor.u32 1.1754944e-38, %v228_v61  ;;  %vm227_vm5 = vcmp.eq.f32.partialorder %v226_v63, 8.507059e+37 }
 0x157   :  { %v285_v58 = vpop.eup %284 }
 0x158   :  { %v218_v59 = vmul.f32 %v285_v58, %v216_v57  ;;  %vm223_vm1 = vweird.f32 %v285_v58 }
 0x159   :  { %vm224_vm3 = vmor %vm222_vm2, %vm223_vm1 }
 0x15a   :  { %v219_v60 = vsub.f32 1.0, %v218_v59 }
 0x15c   :  { %v220_v62 = vmul.f32 %v285_v58, %v219_v60 }
 0x15e   :  { %v221_v0 = vadd.f32 %v285_v58, %v220_v62 }
 0x160   :  { %v225_v2 = vsel %vm224_vm3, %v285_v58, %v221_v0 }
 0x161   :  { %v230_v3 = vsel %vm227_vm5, %v229_v1, %v225_v2 }
 0x162   :  { %233 = vst.msk [vmem:[#allocation10] sm:$0xff] %vm232_vm4, %v230_v3 }
 0x163   :  { %245 = dma.vmem_to_hbm [thread:$0]  %s241_s12, 128, %s243_s8, [#allocation4]  }
 0x164   :  { %436 = dma.done.wait [#allocation4], 128  }
 0x165   :  { %437 = vsyncadd [#allocation4], 4294967168 }
 0x166   :  { %438 = dma.done.wait [#allocation12], 128  }
 0x167   :  { %439 = vsyncadd [#allocation12], 4294967168 }
 0x168   :  { %265 = vsyncpa [#allocation3], 1 }
 0x169   :  { %266 = vsyncpa [#allocation6], 1 }
 0x16a   :  { %267 = vsyncpa [#allocation9], 1 }
 0x16b   :  { %268 = vsyncpa [#allocation4], 1 }
 0x16c   :  { %269 = vsyncpa [#allocation12], 1 }

</bundles_post_ra>
